<compile_context>
chip_gen: v5e
topology: v5e:2x2
jax: 0.10.0
libtpu: 0.0.40
codegen_flags: <defaults>
</compile_context>

<pallas_src>
import functools

import jax
import jax.numpy as jnp
from jax.experimental import pallas as pl
from jax.experimental.pallas import tpu as pltpu


def _logreg_kernel(x_ref, w_ref, b_ref, o_ref):
    # x_ref: (bm, Dp) VMEM tile of lane-packed inputs (Dp = k*D, k samples/row)
    # w_ref: (Dp, k)  VMEM block-diagonal expanded weight (k == 1 -> plain W^T)
    # b_ref: (1, 1)   SMEM scalar bias
    # o_ref: (bm, k)  VMEM output tile (k samples per row, row-major order)
    z = jnp.dot(x_ref[...], w_ref[...], preferred_element_type=jnp.float32)
    z = z + b_ref[0, 0]
    # sigmoid(z) = 0.5 * tanh(z/2) + 0.5 : one EUP push per vreg (vs exp +
    # reciprocal), so the k-lane-narrow epilogue hides under the input DMA.
    o_ref[...] = (0.5 * jnp.tanh(0.5 * z) + 0.5).astype(o_ref.dtype)


def _round_up(n, m):
    return ((n + m - 1) // m) * m


def _vmem_capacity_bytes():
    # v5e/v6e: 128 MiB, v7x: 64 MiB.  Fall back to the conservative (v7x)
    # figure if the query is unavailable on this backend.
    try:
        cap = getattr(pltpu.get_tpu_info(), "vmem_capacity_bytes", None)
    except Exception:
        cap = None
    return int(cap) if cap else 64 * 1024 * 1024


@functools.partial(jax.jit, static_argnames=("block_rows",))
def logistic_regression_forward(x, weight, bias, *, block_rows=None):
    """sigmoid(x @ weight.T + bias).  x: (B, D), weight: (1, D), bias: (1,)."""
    B, D = x.shape
    assert weight.shape == (1, D)
    assert bias.shape == (1,)

    # ---- lane packing: k samples per 128-lane packed row, chosen so that ----
    # ---- x.reshape(R, k*D) is a FREE bitcast (k | B) -> never pad/copy x ----
    k = 1
    if D <= 128:
        cand = 128 // D
        while cand > 1 and (128 % (cand * D) != 0 or B % cand != 0):
            cand -= 1
        k = max(cand, 1)          # k == 1 -> plain unpacked GEMV (still copy-free)
    Dp = k * D
    R = B // k                    # packed rows (exact: k divides B)

    itemsize = jnp.dtype(x.dtype).itemsize
    vmem_cap = _vmem_capacity_bytes()

    # ---- tile sizing: big mem-bound tiles, >= 4 grid steps when possible ----
    if block_rows is None:
        # Per-input-buffer target; Pallas double-buffers the x stream, and the
        # weight / output buffers are tiny.  v7x (64 MiB): ~10.7 MiB/buffer,
        # v5e/v6e (128 MiB): 12 MiB/buffer.
        target_bytes = max(4 * 1024 * 1024, min(12 * 1024 * 1024, vmem_cap // 6))
        bm = max(32, target_bytes // (Dp * itemsize))
        # Keep >= 4 grid steps (>= 2 per TensorCore on v7x megacore) whenever
        # the batch is large enough for that to make sense.
        bm = min(bm, _round_up(pl.cdiv(R, 4), 32))
    else:
        bm = block_rows
    bm = max(32, (bm // 32) * 32)     # sublane-friendly for both f32 and bf16
    if bm >= R:
        bm = R                        # single block; block == full dim is legal
    grid = (pl.cdiv(R, bm),)          # last block may be partial -> Pallas clips

    # ---- wrapper-side views only (bitcasts; NO extra HBM pass over x) ----
    x_packed = x.reshape(R, Dp)

    # Block-diagonal expanded weight: W_pack[j*D + d, j] = w[d]; k == 1 -> W^T.
    # Tiny (Dp x k).  Cast to x.dtype so the MXU runs its native path when x is
    # already stored in bf16; when x is f32 the weight stays f32.
    w_row = weight.reshape(D).astype(jnp.float32)
    eye_k = jnp.eye(k, dtype=jnp.float32)
    w_pack = (w_row[None, :, None] * eye_k[:, None, :]).reshape(Dp, k)
    w_pack = w_pack.astype(x.dtype)

    b2 = bias.reshape(1, 1).astype(jnp.float32)

    cost = pl.CostEstimate(
        flops=2 * B * D,
        transcendentals=B,
        bytes_accessed=B * D * itemsize + Dp * k * itemsize + B * 4,
    )

    out = pl.pallas_call(
        _logreg_kernel,
        out_shape=jax.ShapeDtypeStruct((R, k), jnp.float32),
        grid_spec=pltpu.PrefetchScalarGridSpec(
            num_scalar_prefetch=0,
            grid=grid,
            in_specs=[
                pl.BlockSpec((bm, Dp), lambda i: (i, 0)),   # x tile (lane-dense rows)
                pl.BlockSpec((Dp, k), lambda i: (0, 0)),    # expanded weight (resident)
                pl.BlockSpec(memory_space=pltpu.MemorySpace.SMEM),   # bias scalar
            ],
            out_specs=pl.BlockSpec((bm, k), lambda i: (i, 0)),
        ),
        compiler_params=pltpu.CompilerParams(
            dimension_semantics=("parallel",),
            # 48 MiB on v7x (64 MiB physical), 64 MiB on v5e/v6e (128 MiB).
            vmem_limit_bytes=int(min(3 * vmem_cap // 4, 64 * 1024 * 1024)),
        ),
        cost_estimate=cost,
    )(x_packed, w_pack, b2)

    # (R, k) row-major flatten preserves the original sample order (free bitcast).
    return out.reshape(B, 1)


def init_params(key, input_dim):
    """Deterministic init mimicking nn.Linear default: U(-1/sqrt(D), 1/sqrt(D))."""
    kw, kb = jax.random.split(key)
    bound = 1.0 / jnp.sqrt(jnp.float32(input_dim))
    weight = jax.random.uniform(kw, (1, input_dim), jnp.float32, -bound, bound)
    bias = jax.random.uniform(kb, (1,), jnp.float32, -bound, bound)
    return weight, bias


if __name__ == "__main__":
    key = jax.random.PRNGKey(0)
    kx, kx2, kx3, kp = jax.random.split(key, 4)

    input_dim = 32
    weight, bias = init_params(kp, input_dim)

    # Tolerance accounts for default TPU matmul precision (bf16-truncated
    # products); kernel and jnp reference typically agree to ~1e-6.
    TOL = 2e-2

    # Case 1: batch divisible by the packing factor (k = 4) -> fully copy-free.
    batch = 128
    x = jax.random.normal(kx, (batch, input_dim), jnp.float32)
    y = jax.block_until_ready(logistic_regression_forward(x, weight, bias))
    y_ref = jax.nn.sigmoid(x @ weight.T + bias)
    assert y.shape == (batch, 1)
    assert jnp.allclose(y, y_ref, atol=TOL), float(jnp.max(jnp.abs(y - y_ref)))

    # Case 2: batch not divisible by the tile -> exercises the clipped
    # (masked) partial last grid block; still no padding / copies.
    batch2 = 200
    x2 = jax.random.normal(kx2, (batch2, input_dim), jnp.float32)
    y2 = jax.block_until_ready(logistic_regression_forward(x2, weight, bias))
    y2_ref = jax.nn.sigmoid(x2 @ weight.T + bias)
    assert y2.shape == (batch2, 1)
    assert jnp.allclose(y2, y2_ref, atol=TOL), float(jnp.max(jnp.abs(y2 - y2_ref)))

    # Case 3: odd batch -> falls back to k = 1 (unpacked) path, still copy-free.
    batch3 = 67
    x3 = jax.random.normal(kx3, (batch3, input_dim), jnp.float32)
    y3 = jax.block_until_ready(logistic_regression_forward(x3, weight, bias))
    y3_ref = jax.nn.sigmoid(x3 @ weight.T + bias)
    assert y3.shape == (batch3, 1)
    assert jnp.allclose(y3, y3_ref, atol=TOL), float(jnp.max(jnp.abs(y3 - y3_ref)))

    # Case 4: x already stored in bf16 (no wrapper-side down-cast is inserted;
    # the kernel simply reads the bf16 data, halving HBM read traffic).
    x_bf16 = x.astype(jnp.bfloat16)
    y4 = jax.block_until_ready(logistic_regression_forward(x_bf16, weight, bias))
    y4_ref = jax.nn.sigmoid(x_bf16.astype(jnp.float32) @ weight.T + bias)
    assert y4.shape == (batch, 1)
    assert jnp.allclose(y4, y4_ref, atol=TOL), float(jnp.max(jnp.abs(y4 - y4_ref)))

    print("KERNEL_OK")
</pallas_src>

<mosaic_0001>
module attributes {stable_mosaic.version = 11 : i64} {
  func.func @_logreg_kernel(%arg0: i32, %arg1: memref<32x128xf32, #tpu.memory_space<vmem>>, %arg2: memref<128x4xf32, #tpu.memory_space<vmem>>, %arg3: memref<1x1xf32, #tpu.memory_space<smem>>, %arg4: memref<32x4xf32, #tpu.memory_space<vmem>>) attributes {dimension_semantics = [#tpu.dimension_semantics<parallel>], iteration_bounds = array<i64: 1>, scalar_prefetch = 0 : i64, scratch_operands = 0 : i64, tpu.core_type = #tpu.core_type<tc>, window_params = [{transform_indices = @transform_0, window_bounds = array<i64: 32, 128>}, {pipeline_mode = #tpu.pipeline_mode<synchronous>, transform_indices = @transform_1, window_bounds = array<i64: 128, 4>}, {transform_indices = @transform_2, window_bounds = array<i64: 1, 1>}, {transform_indices = @transform_3, window_bounds = array<i64: 32, 4>}]} {
    %c0 = arith.constant 0 : index
    %c0_0 = arith.constant 0 : index
    %0 = vector.load %arg1[%c0, %c0_0] : memref<32x128xf32, #tpu.memory_space<vmem>>, vector<32x128xf32>
    %c0_1 = arith.constant 0 : index
    %c0_2 = arith.constant 0 : index
    %1 = vector.load %arg2[%c0_1, %c0_2] : memref<128x4xf32, #tpu.memory_space<vmem>>, vector<128x4xf32>
    %cst = arith.constant dense<0.000000e+00> : vector<32x4xf32>
    %2 = tpu.matmul %0, %1, %cst {dimension_numbers = #tpu.dot_dimension_numbers<[1], [0], [0], [1], [0, 0, 1, 1], [], []>} : vector<32x128xf32>, vector<128x4xf32>, vector<32x4xf32> -> vector<32x4xf32>
    %c0_3 = arith.constant 0 : index
    %c0_4 = arith.constant 0 : index
    %3 = memref.load %arg3[%c0_3, %c0_4] : memref<1x1xf32, #tpu.memory_space<smem>>
    %4 = vector.broadcast %3 : f32 to vector<32x4xf32>
    %5 = arith.addf %2, %4 : vector<32x4xf32>
    %cst_5 = arith.constant 5.000000e-01 : f32
    %6 = vector.broadcast %cst_5 : f32 to vector<32x4xf32>
    %7 = arith.mulf %6, %5 : vector<32x4xf32>
    %8 = math.tanh %7 : vector<32x4xf32>
    %cst_6 = arith.constant 5.000000e-01 : f32
    %9 = vector.broadcast %cst_6 : f32 to vector<32x4xf32>
    %10 = arith.mulf %9, %8 : vector<32x4xf32>
    %cst_7 = arith.constant 5.000000e-01 : f32
    %11 = vector.broadcast %cst_7 : f32 to vector<32x4xf32>
    %12 = arith.addf %10, %11 : vector<32x4xf32>
    %c0_8 = arith.constant 0 : index
    %c0_9 = arith.constant 0 : index
    %13 = vector.load %arg4[%c0_8, %c0_9] : memref<32x4xf32, #tpu.memory_space<vmem>>, vector<32x4xf32>
    tpu.vector_store %arg4[%c0_8, %c0_9], %12 {strides = array<i32>} : memref<32x4xf32, #tpu.memory_space<vmem>>, vector<32x4xf32>,
    return
  }
  func.func @transform_0(%arg0: i32) -> (i32, i32) {
    %c0_i32 = arith.constant 0 : i32
    %c0_i32_0 = arith.constant 0 : i32
    return %arg0, %c0_i32 : i32, i32
  }
  func.func @transform_1(%arg0: i32) -> (i32, i32) {
    %c0_i32 = arith.constant 0 : i32
    %c0_i32_0 = arith.constant 0 : i32
    %c0_i32_1 = arith.constant 0 : i32
    return %c0_i32, %c0_i32_0 : i32, i32
  }
  func.func @transform_2(%arg0: i32) -> (i32, i32) {
    %c0_i32 = arith.constant 0 : i32
    %c0_i32_0 = arith.constant 0 : i32
    %c0_i32_1 = arith.constant 0 : i32
    return %c0_i32, %c0_i32_0 : i32, i32
  }
  func.func @transform_3(%arg0: i32) -> (i32, i32) {
    %c0_i32 = arith.constant 0 : i32
    %c0_i32_0 = arith.constant 0 : i32
    return %arg0, %c0_i32 : i32, i32
  }
}

</mosaic_0001>

<bundles_post_ra>
// kernel: logistic_regression_forward.1
= control target key start
LH: loop header
LB: loop body
LE: loop exit
PB: predicated region body
PF: predicated region fallthrough
CT: control target
= control target key end

     0   :  { %vm82_vm0 = vcmask 31744   ;;  %s242_s1 = inlined_call_operand.vmem [shape: f32[128,4], index: 1, kind: input, shape index: {}]   ;;  %s243_s0 = inlined_call_operand.vmem [shape: f32[32,128], index: 0, kind: input, shape index: {}]   ;;  %s244_s2 = inlined_call_operand.<no memory space> [shape: f32[1,1], index: 2, kind: input, shape index: {}]   ;;  %s245_s3 = inlined_call_operand.vmem [shape: f32[32,4], index: 3, kind: output, shape index: {}]  }
   0x1   :  { %v34_v0 = vld [vmem:[%s242_s1 + $0x78] sm:$0xff]  ;;  %v33_v1 = vld [vmem:[%s242_s1 + $0x70] sm:$0xff]  ;;  %v32_v2 = vld [vmem:[%s242_s1 + $0x68] sm:$0xff]  ;;  %v36_v20 = vstv %s244_s2 }
   0x2   :  { %92 = vmatpush.msra.mxu2 %v34_v0  ;;  %93 = vmatpush.msra.mxu3 %v34_v0  ;;  %v31_v3 = vld [vmem:[%s242_s1 + $0x60] sm:$0xff]  ;;  %v30_v4 = vld [vmem:[%s242_s1 + $0x58] sm:$0xff]  ;;  %v29_v5 = vld [vmem:[%s242_s1 + $0x50] sm:$0xff] }
   0x3   :  { %37 = vmatpush.msra.mxu0 %v34_v0  ;;  %91 = vmatpush.msra.mxu1 %v34_v0  ;;  %v28_v6 = vld [vmem:[%s242_s1 + $0x48] sm:$0xff]  ;;  %v27_v7 = vld [vmem:[%s242_s1 + $0x40] sm:$0xff]  ;;  %v26_v8 = vld [vmem:[%s242_s1 + $0x38] sm:$0xff] }
   0x4   :  { %95 = vmatpush.msra.mxu2 %v33_v1  ;;  %96 = vmatpush.msra.mxu3 %v33_v1  ;;  %v25_v9 = vld [vmem:[%s242_s1 + $0x30] sm:$0xff]  ;;  %v24_v10 = vld [vmem:[%s242_s1 + $0x28] sm:$0xff]  ;;  %v23_v11 = vld [vmem:[%s242_s1 + $0x20] sm:$0xff] }
   0x5   :  { %38 = vmatpush.msra.mxu0 %v33_v1  ;;  %94 = vmatpush.msra.mxu1 %v33_v1  ;;  %v22_v12 = vld [vmem:[%s242_s1 + $0x18] sm:$0xff]  ;;  %v21_v13 = vld [vmem:[%s242_s1 + $0x10] sm:$0xff]  ;;  %v20_v14 = vld [vmem:[%s242_s1 + $0x8] sm:$0xff] }
   0x6   :  { %98 = vmatpush.msra.mxu2 %v32_v2  ;;  %99 = vmatpush.msra.mxu3 %v32_v2  ;;  %v19_v15 = vld [vmem:[%s242_s1] sm:$0xff]  ;;  %v17_v16 = vld [vmem:[%s243_s0 + $0x10] sm:$0xff]  ;;  %v18_v17 = vld [vmem:[%s243_s0 + $0x18] sm:$0xff] }
   0x7   :  { %39 = vmatpush.msra.mxu0 %v32_v2  ;;  %97 = vmatpush.msra.mxu1 %v32_v2  ;;  %v15_v18 = vld [vmem:[%s243_s0] sm:$0xff]  ;;  %v16_v19 = vld [vmem:[%s243_s0 + $0x8] sm:$0xff] }
   0x8   :  { %101 = vmatpush.msra.mxu2 %v31_v3  ;;  %102 = vmatpush.msra.mxu3 %v31_v3 }
   0x9   :  { %40 = vmatpush.msra.mxu0 %v31_v3  ;;  %100 = vmatpush.msra.mxu1 %v31_v3 }
   0xa   :  { %104 = vmatpush.msra.mxu2 %v30_v4  ;;  %105 = vmatpush.msra.mxu3 %v30_v4 }
   0xb   :  { %41 = vmatpush.msra.mxu0 %v30_v4  ;;  %103 = vmatpush.msra.mxu1 %v30_v4 }
   0xc   :  { %107 = vmatpush.msra.mxu2 %v29_v5  ;;  %108 = vmatpush.msra.mxu3 %v29_v5 }
   0xd   :  { %42 = vmatpush.msra.mxu0 %v29_v5  ;;  %106 = vmatpush.msra.mxu1 %v29_v5 }
   0xe   :  { %110 = vmatpush.msra.mxu2 %v28_v6  ;;  %111 = vmatpush.msra.mxu3 %v28_v6 }
   0xf   :  { %43 = vmatpush.msra.mxu0 %v28_v6  ;;  %109 = vmatpush.msra.mxu1 %v28_v6 }
  0x10   :  { %113 = vmatpush.msra.mxu2 %v27_v7  ;;  %114 = vmatpush.msra.mxu3 %v27_v7 }
  0x11   :  { %44 = vmatpush.msra.mxu0 %v27_v7  ;;  %112 = vmatpush.msra.mxu1 %v27_v7 }
  0x12   :  { %116 = vmatpush.msra.mxu2 %v26_v8  ;;  %117 = vmatpush.msra.mxu3 %v26_v8 }
  0x13   :  { %45 = vmatpush.msra.mxu0 %v26_v8  ;;  %115 = vmatpush.msra.mxu1 %v26_v8 }
  0x14   :  { %119 = vmatpush.msra.mxu2 %v25_v9  ;;  %120 = vmatpush.msra.mxu3 %v25_v9 }
  0x15   :  { %46 = vmatpush.msra.mxu0 %v25_v9  ;;  %118 = vmatpush.msra.mxu1 %v25_v9 }
  0x16   :  { %122 = vmatpush.msra.mxu2 %v24_v10  ;;  %123 = vmatpush.msra.mxu3 %v24_v10 }
  0x17   :  { %47 = vmatpush.msra.mxu0 %v24_v10  ;;  %121 = vmatpush.msra.mxu1 %v24_v10 }
  0x18   :  { %125 = vmatpush.msra.mxu2 %v23_v11  ;;  %126 = vmatpush.msra.mxu3 %v23_v11 }
  0x19   :  { %48 = vmatpush.msra.mxu0 %v23_v11  ;;  %124 = vmatpush.msra.mxu1 %v23_v11 }
  0x1a   :  { %128 = vmatpush.msra.mxu2 %v22_v12  ;;  %129 = vmatpush.msra.mxu3 %v22_v12 }
  0x1b   :  { %49 = vmatpush.msra.mxu0 %v22_v12  ;;  %127 = vmatpush.msra.mxu1 %v22_v12 }
  0x1c   :  { %131 = vmatpush.msra.mxu2 %v21_v13  ;;  %132 = vmatpush.msra.mxu3 %v21_v13 }
  0x1d   :  { %50 = vmatpush.msra.mxu0 %v21_v13  ;;  %130 = vmatpush.msra.mxu1 %v21_v13 }
  0x1e   :  { %134 = vmatpush.msra.mxu2 %v20_v14  ;;  %135 = vmatpush.msra.mxu3 %v20_v14 }
  0x1f   :  { %51 = vmatpush.msra.mxu0 %v20_v14  ;;  %133 = vmatpush.msra.mxu1 %v20_v14 }
  0x20   :  { %137 = vmatpush.msra.mxu2 %v19_v15  ;;  %138 = vmatpush.msra.mxu3 %v19_v15 }
  0x21   :  { %59 = vmatmul.f32.vlgmr.msra.gmra.mxu2 %v17_v16  ;;  %62 = vmatmul.f32.vlgmr.msra.gmra.mxu3 %v18_v17 }
  0x22   :  { %52 = vmatpush.msra.mxu0 %v19_v15  ;;  %136 = vmatpush.msra.mxu1 %v19_v15 }
  0x23   :  { %53 = vmatmul.f32.vlgmr.msra.gmra.mxu0 %v15_v18  ;;  %56 = vmatmul.f32.vlgmr.msra.gmra.mxu1 %v16_v19 }
  0xa0   :  { %v54_v21 = vpop.f32.mrf.mxu0  ;;  %v57_v22 = vpop.f32.mrf.mxu1 }
  0xa1   :  { %v55_v23 = vadd.f32 %v54_v21, %v36_v20  ;;  %v58_v24 = vadd.f32 %v57_v22, %v36_v20 }
  0xa3   :  { %v66_v25 = vmul.f32 0.5, %v55_v23  ;;  %v67_v26 = vmul.f32 0.5, %v58_v24 }
  0xa4   :  { %v60_v27 = vpop.f32.mrf.mxu2  ;;  %v63_v28 = vpop.f32.mrf.mxu3 }
  0xa5   :  { %139 = vtanh.f32 %v66_v25  ;;  %v61_v29 = vadd.f32 %v60_v27, %v36_v20  ;;  %v64_v30 = vadd.f32 %v63_v28, %v36_v20 }
  0xa6   :  { %141 = vtanh.f32 %v67_v26 }
  0xa7   :  { %v68_v31 = vmul.f32 0.5, %v61_v29  ;;  %v69_v32 = vmul.f32 0.5, %v64_v30 }
  0xa9   :  { %143 = vtanh.f32 %v68_v31 }
  0xaa   :  { %145 = vtanh.f32 %v69_v32 }
  0xab   :  { %v140_v33 = vpop.eup %139 }
  0xac   :  { %v142_v34 = vpop.eup %141  ;;  %v74_v35 = vmul.f32 0.5, %v140_v33 }
  0xad   :  { %v75_v36 = vmul.f32 0.5, %v142_v34 }
  0xae   :  { %v78_v37 = vadd.f32 0.5, %v74_v35 }
  0xaf   :  { %v144_v38 = vpop.eup %143  ;;  %v79_v39 = vadd.f32 0.5, %v75_v36 }
  0xb0   :  { %v146_v40 = vpop.eup %145  ;;  %83 = vst.msk [vmem:[%s245_s3] sm:$0xff] %vm82_vm0, %v78_v37  ;;  %v76_v41 = vmul.f32 0.5, %v144_v38 }
  0xb1   :  { %84 = vst.msk [vmem:[%s245_s3 + $0x8] sm:$0xff] %vm82_vm0, %v79_v39  ;;  %v77_v42 = vmul.f32 0.5, %v146_v40 }
  0xb2   :  { %v80_v43 = vadd.f32 0.5, %v76_v41 }
  0xb3   :  { %v81_v44 = vadd.f32 0.5, %v77_v42 }
  0xb4   :  { %85 = vst.msk [vmem:[%s245_s3 + $0x10] sm:$0xff] %vm82_vm0, %v80_v43 }
  0xb5   :  { %86 = vst.msk [vmem:[%s245_s3 + $0x18] sm:$0xff] %vm82_vm0, %v81_v44 }

</bundles_post_ra>
